<compile_context>
chip_gen: v7x
topology: tpu7x:2x2x1
jax: 0.10.0
libtpu: 0.0.40
codegen_flags: <defaults>
</compile_context>

<pallas_src>
import jax
import jax.numpy as jnp
from jax.experimental import pallas as pl
from jax.experimental.pallas import tpu as pltpu


def _round_up(n, m):
    return ((n + m - 1) // m) * m


def _batch_tile(batch, block_batch):
    """Sublane-aligned batch tile; >=2 grid steps when the batch allows it."""
    b8 = _round_up(batch, 8)
    if b8 <= 8:
        return 8
    half = _round_up((b8 + 1) // 2, 8)        # aim for at least 2 grid steps
    return max(8, min(block_batch, half))


def actor_critic_kernel(x_ref, w1_ref, b1_ref, w2_ref, b2_ref, w3_ref, b3_ref,
                        probs_ref, value_ref):
    # process: Linear(obs -> H) + ReLU (bf16 operands, f32 accumulation)
    h = jnp.dot(x_ref[...], w1_ref[...],
                preferred_element_type=jnp.float32) + b1_ref[...]
    h = jnp.maximum(h, 0.0)                       # (tb, H) f32
    hb = h.astype(jnp.bfloat16)

    # actor head: softmax(h @ W2 + b2, axis=1), exact normalization
    logits = jnp.dot(hb, w2_ref[...],
                     preferred_element_type=jnp.float32) + b2_ref[...]
    m = jnp.max(logits, axis=1, keepdims=True)
    e = jnp.exp(logits - m)
    probs_ref[...] = e / jnp.sum(e, axis=1, keepdims=True)

    # critic head: h @ W3 + b3  (narrow (tb, 1) output)
    value_ref[...] = jnp.dot(hb, w3_ref[...],
                             preferred_element_type=jnp.float32) + b3_ref[...]


def actor_critic_forward(x, w1, b1, w2, b2, w3, b3, *, block_batch=4096):
    """Returns (action_probs (B, A), state_value (B,)) like the PyTorch module."""
    B, obs = x.shape
    H = w1.shape[1]
    A = w2.shape[1]

    # Batch tiling: sublane-aligned tile; batch padded so the grid divides evenly.
    tb = _batch_tile(B, block_batch)
    b_pad = _round_up(B, tb)

    xb = x.astype(jnp.bfloat16)                   # halves the x input DMA
    if b_pad != B:
        xb = jnp.pad(xb, ((0, b_pad - B), (0, 0)))

    probs, value = pl.pallas_call(
        actor_critic_kernel,
        out_shape=(
            jax.ShapeDtypeStruct((b_pad, A), jnp.float32),
            jax.ShapeDtypeStruct((b_pad, 1), jnp.float32),
        ),
        grid=(b_pad // tb,),
        in_specs=[
            pl.BlockSpec((tb, obs), lambda i: (i, 0)),   # x: tiled over batch
            pl.BlockSpec(w1.shape, lambda i: (0, 0)),    # weights stay resident
            pl.BlockSpec(b1.shape, lambda i: (0, 0)),
            pl.BlockSpec(w2.shape, lambda i: (0, 0)),
            pl.BlockSpec(b2.shape, lambda i: (0, 0)),
            pl.BlockSpec(w3.shape, lambda i: (0, 0)),
            pl.BlockSpec(b3.shape, lambda i: (0, 0)),
        ],
        out_specs=(
            pl.BlockSpec((tb, A), lambda i: (i, 0)),     # narrow probs output
            pl.BlockSpec((tb, 1), lambda i: (i, 0)),     # narrow value output
        ),
        compiler_params=pltpu.CompilerParams(
            dimension_semantics=("parallel",)),
    )(xb, w1, b1, w2, b2, w3, b3)

    if b_pad != B:
        probs = probs[:B]
        value = value[:B]
    return probs, value.reshape(-1)


def init_params(key, observation_space, action_space, hidden=10):
    """Deterministic synthetic init. Biases are zero (matching .fill_(0)).

    Weights are stored in bf16 once here (MXU-native operands); biases in f32.
    """
    k1, k2, k3 = jax.random.split(key, 3)
    scale = 0.1
    w1 = (scale * jax.random.normal(k1, (observation_space, hidden),
                                    jnp.float32)).astype(jnp.bfloat16)
    b1 = jnp.zeros((1, hidden), jnp.float32)
    w2 = (scale * jax.random.normal(k2, (hidden, action_space),
                                    jnp.float32)).astype(jnp.bfloat16)
    b2 = jnp.zeros((1, action_space), jnp.float32)
    w3 = (scale * jax.random.normal(k3, (hidden, 1),
                                    jnp.float32)).astype(jnp.bfloat16)
    b3 = jnp.zeros((1, 1), jnp.float32)
    return w1, b1, w2, b2, w3, b3


if __name__ == "__main__":
    observation_space = 16
    action_space = 6
    batch = 4

    key = jax.random.PRNGKey(0)
    kx, kp = jax.random.split(key)

    x = jax.random.normal(kx, (batch, observation_space), jnp.float32)
    params = init_params(kp, observation_space, action_space)

    probs, value = actor_critic_forward(x, *params)
    jax.block_until_ready((probs, value))

    # sanity checks against a pure-JAX reference that emulates the bf16 casts
    w1, b1, w2, b2, w3, b3 = params
    w1f, w2f, w3f = (w.astype(jnp.float32) for w in (w1, w2, w3))
    xr = x.astype(jnp.bfloat16).astype(jnp.float32)
    h_ref = jnp.maximum(xr @ w1f + b1, 0.0)
    hr = h_ref.astype(jnp.bfloat16).astype(jnp.float32)
    probs_ref = jax.nn.softmax(hr @ w2f + b2, axis=1)
    value_ref = (hr @ w3f + b3).reshape(-1)

    assert probs.shape == (batch, action_space)
    assert value.shape == (batch,)
    assert jnp.allclose(probs, probs_ref, atol=1e-3)
    assert jnp.allclose(value, value_ref, atol=1e-3)
    # exact softmax normalization -> rows sum to 1 up to float rounding
    assert jnp.allclose(jnp.sum(probs, axis=1), 1.0, atol=1e-3)

    print("KERNEL_OK")
</pallas_src>

<mosaic_0001>
module attributes {stable_mosaic.version = 11 : i64} {
  func.func @actor_critic_kernel(%arg0: i32, %arg1: memref<8x16xbf16, #tpu.memory_space<vmem>>, %arg2: memref<16x10xbf16, #tpu.memory_space<vmem>>, %arg3: memref<1x10xf32, #tpu.memory_space<vmem>>, %arg4: memref<10x6xbf16, #tpu.memory_space<vmem>>, %arg5: memref<1x6xf32, #tpu.memory_space<vmem>>, %arg6: memref<10x1xbf16, #tpu.memory_space<vmem>>, %arg7: memref<1x1xf32, #tpu.memory_space<vmem>>, %arg8: memref<8x6xf32, #tpu.memory_space<vmem>>, %arg9: memref<8x1xf32, #tpu.memory_space<vmem>>) attributes {dimension_semantics = [#tpu.dimension_semantics<parallel>], iteration_bounds = array<i64: 1>, scalar_prefetch = 0 : i64, scratch_operands = 0 : i64, tpu.core_type = #tpu.core_type<tc>, window_params = [{transform_indices = @transform_0, window_bounds = array<i64: 8, 16>}, {pipeline_mode = #tpu.pipeline_mode<synchronous>, transform_indices = @transform_1, window_bounds = array<i64: 16, 10>}, {pipeline_mode = #tpu.pipeline_mode<synchronous>, transform_indices = @transform_2, window_bounds = array<i64: 1, 10>}, {pipeline_mode = #tpu.pipeline_mode<synchronous>, transform_indices = @transform_3, window_bounds = array<i64: 10, 6>}, {pipeline_mode = #tpu.pipeline_mode<synchronous>, transform_indices = @transform_4, window_bounds = array<i64: 1, 6>}, {pipeline_mode = #tpu.pipeline_mode<synchronous>, transform_indices = @transform_5, window_bounds = array<i64: 10, 1>}, {pipeline_mode = #tpu.pipeline_mode<synchronous>, transform_indices = @transform_6, window_bounds = array<i64: 1, 1>}, {transform_indices = @transform_7, window_bounds = array<i64: 8, 6>}, {transform_indices = @transform_8, window_bounds = array<i64: 8, 1>}]} {
    %c0 = arith.constant 0 : index
    %c0_0 = arith.constant 0 : index
    %0 = vector.load %arg1[%c0, %c0_0] : memref<8x16xbf16, #tpu.memory_space<vmem>>, vector<8x16xbf16>
    %c0_1 = arith.constant 0 : index
    %c0_2 = arith.constant 0 : index
    %1 = vector.load %arg2[%c0_1, %c0_2] : memref<16x10xbf16, #tpu.memory_space<vmem>>, vector<16x10xbf16>
    %cst = arith.constant dense<0.000000e+00> : vector<8x10xf32>
    %2 = tpu.matmul %0, %1, %cst {dimension_numbers = #tpu.dot_dimension_numbers<[1], [0], [0], [1], [0, 0, 1, 1], [], []>} : vector<8x16xbf16>, vector<16x10xbf16>, vector<8x10xf32> -> vector<8x10xf32>
    %c0_3 = arith.constant 0 : index
    %c0_4 = arith.constant 0 : index
    %3 = vector.load %arg3[%c0_3, %c0_4] : memref<1x10xf32, #tpu.memory_space<vmem>>, vector<1x10xf32>
    %4 = vector.broadcast %3 : vector<1x10xf32> to vector<8x10xf32>
    %5 = arith.addf %2, %4 : vector<8x10xf32>
    %cst_5 = arith.constant 0.000000e+00 : f32
    %6 = vector.broadcast %cst_5 : f32 to vector<8x10xf32>
    %7 = arith.maximumf %5, %6 : vector<8x10xf32>
    %8 = arith.truncf %7 : vector<8x10xf32> to vector<8x10xbf16>
    %c0_6 = arith.constant 0 : index
    %c0_7 = arith.constant 0 : index
    %9 = vector.load %arg4[%c0_6, %c0_7] : memref<10x6xbf16, #tpu.memory_space<vmem>>, vector<10x6xbf16>
    %cst_8 = arith.constant dense<0.000000e+00> : vector<8x6xf32>
    %10 = tpu.matmul %8, %9, %cst_8 {dimension_numbers = #tpu.dot_dimension_numbers<[1], [0], [0], [1], [0, 0, 1, 1], [], []>} : vector<8x10xbf16>, vector<10x6xbf16>, vector<8x6xf32> -> vector<8x6xf32>
    %c0_9 = arith.constant 0 : index
    %c0_10 = arith.constant 0 : index
    %11 = vector.load %arg5[%c0_9, %c0_10] : memref<1x6xf32, #tpu.memory_space<vmem>>, vector<1x6xf32>
    %12 = vector.broadcast %11 : vector<1x6xf32> to vector<8x6xf32>
    %13 = arith.addf %10, %12 : vector<8x6xf32>
    %cst_11 = arith.constant dense<0xFF800000> : vector<8xf32>
    %14 = vector.multi_reduction <maximumf>, %13, %cst_11 [1] : vector<8x6xf32> to vector<8xf32>
    %15 = vector.shape_cast %14 : vector<8xf32> to vector<8x1xf32>
    %16 = vector.broadcast %15 : vector<8x1xf32> to vector<8x6xf32>
    %17 = arith.subf %13, %16 : vector<8x6xf32>
    %18 = math.exp %17 : vector<8x6xf32>
    %cst_12 = arith.constant dense<0.000000e+00> : vector<8xf32>
    %19 = vector.multi_reduction <add>, %18, %cst_12 [1] : vector<8x6xf32> to vector<8xf32>
    %20 = vector.shape_cast %19 : vector<8xf32> to vector<8x1xf32>
    %21 = vector.broadcast %20 : vector<8x1xf32> to vector<8x6xf32>
    %22 = arith.divf %18, %21 : vector<8x6xf32>
    %c0_13 = arith.constant 0 : index
    %c0_14 = arith.constant 0 : index
    %23 = vector.load %arg8[%c0_13, %c0_14] : memref<8x6xf32, #tpu.memory_space<vmem>>, vector<8x6xf32>
    tpu.vector_store %arg8[%c0_13, %c0_14], %22 {strides = array<i32>} : memref<8x6xf32, #tpu.memory_space<vmem>>, vector<8x6xf32>,
    %c0_15 = arith.constant 0 : index
    %c0_16 = arith.constant 0 : index
    %24 = vector.load %arg6[%c0_15, %c0_16] : memref<10x1xbf16, #tpu.memory_space<vmem>>, vector<10x1xbf16>
    %cst_17 = arith.constant dense<0.000000e+00> : vector<8x1xf32>
    %25 = tpu.matmul %8, %24, %cst_17 {dimension_numbers = #tpu.dot_dimension_numbers<[1], [0], [0], [1], [0, 0, 1, 1], [], []>} : vector<8x10xbf16>, vector<10x1xbf16>, vector<8x1xf32> -> vector<8x1xf32>
    %c0_18 = arith.constant 0 : index
    %c0_19 = arith.constant 0 : index
    %26 = vector.load %arg7[%c0_18, %c0_19] : memref<1x1xf32, #tpu.memory_space<vmem>>, vector<1x1xf32>
    %27 = vector.broadcast %26 : vector<1x1xf32> to vector<8x1xf32>
    %28 = arith.addf %25, %27 : vector<8x1xf32>
    %c0_20 = arith.constant 0 : index
    %c0_21 = arith.constant 0 : index
    %29 = vector.load %arg9[%c0_20, %c0_21] : memref<8x1xf32, #tpu.memory_space<vmem>>, vector<8x1xf32>
    tpu.vector_store %arg9[%c0_20, %c0_21], %28 {strides = array<i32>} : memref<8x1xf32, #tpu.memory_space<vmem>>, vector<8x1xf32>,
    return
  }
  func.func @transform_0(%arg0: i32) -> (i32, i32) {
    %c0_i32 = arith.constant 0 : i32
    %c0_i32_0 = arith.constant 0 : i32
    return %arg0, %c0_i32 : i32, i32
  }
  func.func @transform_1(%arg0: i32) -> (i32, i32) {
    %c0_i32 = arith.constant 0 : i32
    %c0_i32_0 = arith.constant 0 : i32
    %c0_i32_1 = arith.constant 0 : i32
    return %c0_i32, %c0_i32_0 : i32, i32
  }
  func.func @transform_2(%arg0: i32) -> (i32, i32) {
    %c0_i32 = arith.constant 0 : i32
    %c0_i32_0 = arith.constant 0 : i32
    %c0_i32_1 = arith.constant 0 : i32
    return %c0_i32, %c0_i32_0 : i32, i32
  }
  func.func @transform_3(%arg0: i32) -> (i32, i32) {
    %c0_i32 = arith.constant 0 : i32
    %c0_i32_0 = arith.constant 0 : i32
    %c0_i32_1 = arith.constant 0 : i32
    return %c0_i32, %c0_i32_0 : i32, i32
  }
  func.func @transform_4(%arg0: i32) -> (i32, i32) {
    %c0_i32 = arith.constant 0 : i32
    %c0_i32_0 = arith.constant 0 : i32
    %c0_i32_1 = arith.constant 0 : i32
    return %c0_i32, %c0_i32_0 : i32, i32
  }
  func.func @transform_5(%arg0: i32) -> (i32, i32) {
    %c0_i32 = arith.constant 0 : i32
    %c0_i32_0 = arith.constant 0 : i32
    %c0_i32_1 = arith.constant 0 : i32
    return %c0_i32, %c0_i32_0 : i32, i32
  }
  func.func @transform_6(%arg0: i32) -> (i32, i32) {
    %c0_i32 = arith.constant 0 : i32
    %c0_i32_0 = arith.constant 0 : i32
    %c0_i32_1 = arith.constant 0 : i32
    return %c0_i32, %c0_i32_0 : i32, i32
  }
  func.func @transform_7(%arg0: i32) -> (i32, i32) {
    %c0_i32 = arith.constant 0 : i32
    %c0_i32_0 = arith.constant 0 : i32
    return %arg0, %c0_i32 : i32, i32
  }
  func.func @transform_8(%arg0: i32) -> (i32, i32) {
    %c0_i32 = arith.constant 0 : i32
    %c0_i32_0 = arith.constant 0 : i32
    return %arg0, %c0_i32 : i32, i32
  }
}

</mosaic_0001>

<bundles_post_ra>
// kernel: tpu_custom_call.1
= control target key start
LH: loop header
LB: loop body
LE: loop exit
PB: predicated region body
PF: predicated region fallthrough
CT: control target
= control target key end

     0   :  { %s400_s0 = inlined_call_operand.vmem [shape: bf16[8,16], index: 0, kind: input, shape index: {}]   ;;  %s401_s1 = inlined_call_operand.vmem [shape: bf16[16,10], index: 1, kind: input, shape index: {}]   ;;  %s402_s2 = inlined_call_operand.vmem [shape: f32[1,10], index: 2, kind: input, shape index: {}]   ;;  %s403_s3 = inlined_call_operand.vmem [shape: bf16[10,6], index: 3, kind: input, shape index: {}]   ;;  %s404_s4 = inlined_call_operand.vmem [shape: f32[1,6], index: 4, kind: input, shape index: {}]   ;;  %s405_s5 = inlined_call_operand.vmem [shape: bf16[10,1], index: 5, kind: input, shape index: {}]   ;;  %s406_s6 = inlined_call_operand.<no memory space> [shape: f32[1,1], index: 6, kind: input, shape index: {}]   ;;  %s407_s7 = inlined_call_operand.hbm [shape: f32[8,6], index: 7, kind: output, shape index: {0}]   ;;  %s408_s8 = inlined_call_operand.vmem [shape: f32[8,1], index: 8, kind: output, shape index: {1}]  }
   0x1   :  { %v14_v0 = vstv %s406_s6 }
   0x2   :  { %15 = vst [vmem:[#allocation2] sm:$0x1] %v14_v0 }
   0x3   :  { %v282_v1 = vld [vmem:[%s401_s1] sm:$0xff]   ;;  %v313_v2 = vmov 0.0   ;;  %vm48_vm0 = vcmask 130048   ;;  %vm314_vm1 = vmmov 0  }
   0x4   :  { %261 = vmatprep.subr.bf16.mxu0 %v313_v2  ;;  %v32_v3 = vld [vmem:[%s400_s0] sm:$0xf]  ;;  %267 = vmatprep.subr.bf16.mxu1 %v313_v2 }
   0x5   :  { %262 = vmatpush3.bf16.msra.mxu0 %v282_v1  ;;  %263 = vmatprep.mubr.msk.bf16.mxu0 %vm314_vm1, %v313_v2 }
   0x6   :  { %273 = vmatprep.subr.bf16.mxu0 %v313_v2  ;;  %269 = vmatprep.mubr.msk.bf16.mxu1 %vm314_vm1, %v313_v2 }
   0x7   :  { %16 = vsyncpa [#allocation4], 0  ;;  %v283_v4 = vld [vmem:[%s403_s3] sm:$0x1f]   ;;  %vm112_vm2 = vcmask 1044480   ;;  %vm108_vm3 = vcmask 80896  }
   0x8   :  { %264 = vmatmul.mubr.msk.bf16.vlgmr.msra.gmra.mrb[0].mxu0 %vm48_vm0, %v32_v3  ;;  %v284_v5 = vld [vmem:[%s405_s5] sm:$0x1f]   ;;  %v114_v6 = vsel %vm112_vm2, %v283_v4, 0  ;;  %vm226_vm4 = vcmask 7168   ;;  %vm156_vm5 = vcmask 48128  }
   0x9   :  { %275 = vmatprep.mubr.msk.bf16.mxu0 %vm314_vm1, %v313_v2  ;;  %v184_v7 = vsel %vm112_vm2, %v284_v5, 0  ;;  %268 = vmatpush3.bf16.msra.mxu1 %v114_v6  ;;  %v246_v8 = vld [vmem:[%s402_s2] ss:$0 sm:$0xff] }
   0xa   :  { %274 = vmatpush3.bf16.msra.mxu0 %v184_v7  ;;  %v249_v16 = vld [vmem:[%s404_s4] ss:$0 sm:$0xff]  ;;  %s315_s4 = smov [#allocation3]  }
   0xb   :  { %v252_v17 = vld [vmem:[#allocation2] ss:$0 sm:$0xff]  ;;  %s234_s15 = sshll.u32 %s315_s4, 4  ;;  %s235_s15 = int_to_ptr.vmem [resolvable:$true] %s234_s15 }
   0xc   :  { %p294_p1 = scmp.lt.s32.totalorder %s235_s15, %s235_s15 }
  0xdb   :  { %v86_v9 = vpop.f32.mrb[0].mxu0 }
  0xdc   :  { %v87_v10 = vadd.f32 %v246_v8, %v86_v9  ;;  %v265_v11 = vpop.f32.mrb[1].mxu0 }
  0xdd   :  { %v89_v12 = vpop.f32.mrb[2].mxu0 }
  0xde   :  { %v92_v13 = vmax.f32 %v87_v10, 0.0  ;;  %v266_v14 = vpop.f32.mrb[3].mxu0 }
  0xe0   :  { %v93_v15 = vpack.c.bf16 %v92_v13, %v92_v13 }
  0xe2   :  { %270 = vmatmul.mubr.msk.bf16.vlgmr.msra.gmra.mrb[0].mxu1 %vm108_vm3, %v93_v15  ;;  %276 = vmatmul.mubr.msk.bf16.vlgmr.msra.gmra.mrb[4].mxu0 %vm108_vm3, %v93_v15 }
 0x1b5   :  { %v150_v18 = vpop.f32.mrb[0].mxu1  ;;  %v220_v19 = vpop.f32.mrb[4].mxu0 }
 0x1b6   :  { %v151_v20 = vadd.f32 %v249_v16, %v150_v18  ;;  %v221_v21 = vadd.f32 %v252_v17, %v220_v19  ;;  %v271_v22 = vpop.f32.mrb[1].mxu1  ;;  %v277_v23 = vpop.f32.mrb[5].mxu0 }
 0x1b7   :  { %v153_v24 = vpop.f32.mrb[2].mxu1  ;;  %v223_v25 = vpop.f32.mrb[6].mxu0 }
 0x1b8   :  { %227 = vst.msk [vmem:[%s408_s8] sm:$0xff] %vm226_vm4, %v221_v21  ;;  %v272_v26 = vpop.f32.mrb[3].mxu1  ;;  %v278_v27 = vpop.f32.mrb[7].mxu0  ;;  %v157_v28 = vsel %vm156_vm5, %v151_v20, -inf  ;;  %s289_s8 = scalar_lea.vmem %s235_s15, 128 }
 0x1b9   :  { %158 = vmax.xlane.f32.xlu0 %v157_v28  ;;  %p290_p0 = scmp.ne.s32.totalorder %s235_s15, %s289_s8  ;;  %p295_p2 = scmp.lt.s32.totalorder %s289_s8, %s289_s8 }
 0x1bb   :  { %p296_p3 = por %p295_p2, %p294_p1 }
 0x1bd   :  { %p297_p4 = pnand %p296_p3, %p290_p0 }
 0x246   :  { %v159_v29 = vpop.xlane.xlu0 %158 }
 0x247   :  { %v160_v30 = vsub.f32 %v151_v20, %v159_v29 }
 0x249   :  { %v161_v31 = vmul.f32 1.442695, %v160_v30 }
 0x24b   :  { %285 = vpow2.f32 %v161_v31 }
 0x255   :  { %v286_v32 = vpop.eup %285 }
 0x256   :  { %v163_v33 = vsel %vm156_vm5, %v286_v32, 0.0 }
 0x257   :  { %164 = vadd.xlane.f32.xlu0 %v163_v33 }
 0x2e4   :  { %v165_v34 = vpop.xlane.xlu0 %164 }
 0x2e5   :  { %287 = vrcp.f32 %v165_v34 }
 0x2ef   :  { %v288_v35 = vpop.eup %287 }
 0x2f0   :  { %v167_v36 = vmul.f32 %v288_v35, %v286_v32 }
 0x2f2   :  { %168 = vst.msk [vmem:[#allocation3] sm:$0xff] %vm156_vm5, %v167_v36 }
 0x2f3   :  { %300 = shalt.err (!%p297_p4)
}
 0x2f4   :  { %s301_s18 = scalar_lea.hbm %s407_s7, 128 }
 0x2f5   :  { %p302_p5 = scmp.ne.s32.totalorder %s407_s7, %s301_s18  ;;  %p305_p6 = scmp.lt.u32.totalorder %s301_s18, %s407_s7 }
 0x2f7   :  { %p307_p7 = pnand %p305_p6, %p302_p5 }
 0x2f9   :  { %310 = shalt.err (!%p307_p7)
}
 0x2fa   :  { %237 = dma.vmem_to_hbm [thread:$0]  %s235_s15, 128, %s407_s7, [#allocation4]  }
 0x2fb   :  { %311 = dma.done.wait [#allocation4], 128  }
 0x2fc   :  { %312 = vsyncadd [#allocation4], 4294967168 }
 0x2fd   :  { %245 = vsyncpa [#allocation4], 1 }

</bundles_post_ra>
